<compile_context>
chip_gen: v6e
topology: v6e:2x2x1
jax: 0.10.0
libtpu: 0.0.40
codegen_flags: <defaults>
</compile_context>

<pallas_src>
import jax
import jax.numpy as jnp
from jax.experimental import pallas as pl
from jax.experimental.pallas import tpu as pltpu


def frame_classifier_kernel(h_ref, pos_ref, beta_ref, w1c_ref, w1t_ref,
                            b1_ref, w2_ref, b2_ref, out_ref):
    # h_ref   : (Bt, S, H)  last_hidden_state tile (storage dtype, e.g. bf16)
    # pos_ref : (Bt, S)     position weights (e.g. one-hot of target), f32
    # beta_ref: (Bt, S)     beta mask (0 => masked out of softmax), f32
    # w1c_ref : (H, H)      linear_1 weight rows acting on `context`, bf16
    # w1t_ref : (H, H)      linear_1 weight rows acting on `target`,  bf16
    # b1_ref  : (1, H)      f32
    # w2_ref  : (H, L)      linear_2 weight, pre-transposed (in, out), bf16
    # b2_ref  : (1, L)      f32
    # out_ref : (Bt, L)     f32
    h = h_ref[...]                                     # (Bt, S, H) bf16
    pos = pos_ref[...]                                 # (Bt, S) f32
    beta = beta_ref[...]                               # (Bt, S) f32

    # ---- attention pooling, vectorized over the whole batch tile ---------
    # target[b,h] = sum_s pos[b,s]   * h[b,s,h]   (torch.bmm(h^T, position))
    # bf16 * f32 promotes element-wise to f32; sums accumulate in f32.
    target = jnp.sum(h * pos[:, :, None], axis=1)      # (Bt, H) f32
    # scores[b,s] = sum_h h[b,s,h] * target[b,h]  (torch.bmm(h, target))
    # Lane-axis reduce on the VPU/XLU — no (S,H) transpose, no M=1 matmuls.
    scores = jnp.sum(h * target[:, None, :], axis=2)   # (Bt, S) f32

    # masked_fill(beta == 0, -1e18) + softmax over S, all in f32.
    masked = jnp.where(beta == 0.0, jnp.float32(-1e18), scores)
    m = jnp.max(masked, axis=-1, keepdims=True)
    p = jnp.exp(masked - m)
    denom = jnp.sum(p, axis=-1, keepdims=True)
    align = p * pl.reciprocal(denom, approx=True)      # (Bt, S) f32, EUP recip

    # context[b,h] = sum_s align[b,s] * h[b,s,h]  (torch.bmm(h^T, alignment))
    context = jnp.sum(h * align[:, :, None], axis=1)   # (Bt, H) f32

    # ---- classifier MLP on the MXU (bf16 operands, f32 accumulation) -----
    # cat((context, target), 1) @ W1 == context @ W1[:H] + target @ W1[H:]
    ctx16 = context.astype(w1c_ref.dtype)
    tgt16 = target.astype(w1t_ref.dtype)
    y1 = jnp.tanh(
        jnp.dot(ctx16, w1c_ref[...], preferred_element_type=jnp.float32)
        + jnp.dot(tgt16, w1t_ref[...], preferred_element_type=jnp.float32)
        + b1_ref[...])
    y2 = (jnp.dot(y1.astype(w2_ref.dtype), w2_ref[...],
                  preferred_element_type=jnp.float32) + b2_ref[...])
    # NOTE: (Bt, L) with L < 128 uses masked partial stores; output bytes are
    # negligible vs. the h DMA, so this is left as-is.
    out_ref[...] = y2.astype(out_ref.dtype)


def frame_classifier_head(h, pos, beta, w1t, b1, w2t, b2, *, b_tile=8):
    """h: (B,S,H); pos, beta: (B,S); w1t: (2H,H); b1: (1,H); w2t: (H,L); b2: (1,L).

    Production tiling notes (sweep b_tile per generation):
      * v5e/v6e (128 MiB VMEM, ~0.8/1.4 TB/s HBM): DMA-bound; b_tile 16-32 at
        S=512,H=768 bf16 and raise vmem_limit_bytes to cover the 2x Bt*S*H*2B
        h double-buffer plus single-buffered weights.
      * v7x (64 MiB VMEM/TC, 3.2 TB/s HBM, 2 TCs): keep 2*(Bt*S*H*2B) + bf16
        weights well under ~48 MiB and make the grid an even multiple >= 4 so
        each core pipelines >= 2 steps (b_tile=16 fits; b_tile=32 does not).
    """
    B, S, H = h.shape
    L = w2t.shape[1]
    b_tile = min(b_tile, B)

    # Pad ragged batches up to a multiple of the batch tile; padded rows have
    # beta == 0 / h == 0 everywhere (finite garbage) and are sliced off below.
    pad = (-B) % b_tile
    if pad:
        h = jnp.pad(h, ((0, pad), (0, 0), (0, 0)))
        pos = jnp.pad(pos, ((0, pad), (0, 0)))
        beta = jnp.pad(beta, ((0, pad), (0, 0)))
    b_padded = B + pad

    # Split linear_1's weight so the kernel never materializes
    # cat((context, target), 1); cast MXU weight operands to bf16 (matmuls
    # still accumulate in f32 on the MXU).
    w1_ctx = w1t[:H].astype(jnp.bfloat16)
    w1_tgt = w1t[H:].astype(jnp.bfloat16)
    w2_b16 = w2t.astype(jnp.bfloat16)
    b1 = b1.astype(jnp.float32)
    b2 = b2.astype(jnp.float32)

    # Grid-invariant operands (constant index_map): fetch once, single-buffer.
    const_buf = dict(pipeline_mode=pl.Buffered(buffer_count=1))

    out = pl.pallas_call(
        frame_classifier_kernel,
        out_shape=jax.ShapeDtypeStruct((b_padded, L), jnp.float32),
        grid_spec=pltpu.PrefetchScalarGridSpec(
            num_scalar_prefetch=0,
            grid=(b_padded // b_tile,),
            in_specs=[
                pl.BlockSpec((b_tile, S, H), lambda i: (i, 0, 0)),
                pl.BlockSpec((b_tile, S), lambda i: (i, 0)),
                pl.BlockSpec((b_tile, S), lambda i: (i, 0)),
                pl.BlockSpec((H, H), lambda i: (0, 0), **const_buf),  # W1 ctx
                pl.BlockSpec((H, H), lambda i: (0, 0), **const_buf),  # W1 tgt
                pl.BlockSpec((1, H), lambda i: (0, 0), **const_buf),  # b1
                pl.BlockSpec((H, L), lambda i: (0, 0), **const_buf),  # W2
                pl.BlockSpec((1, L), lambda i: (0, 0), **const_buf),  # b2
            ],
            out_specs=pl.BlockSpec((b_tile, L), lambda i: (i, 0)),
        ),
        compiler_params=pltpu.CompilerParams(
            # Batch axis is independent -> shardable across v7x's 2 TensorCores.
            dimension_semantics=("parallel",),
            # Headroom above the default scoped-VMEM limit for production
            # tiles (S=512, H=768, b_tile up to 16, bf16) with full h
            # double-buffering; 48 MiB fits every generation (v7x: 64 MiB/TC).
            vmem_limit_bytes=48 * 1024 * 1024,
        ),
    )(h, pos, beta, w1_ctx, w1_tgt, b1, w2_b16, b2)
    return out[:B]


if __name__ == "__main__":
    key = jax.random.PRNGKey(0)
    # B deliberately NOT a multiple of b_tile to exercise the padded tail path;
    # padded grid = 32/8 = 4 steps (>= 2 steps per v7x TensorCore).
    B, S, H, V, L = 30, 8, 128, 64, 16   # batch, seq, hidden, vocab, labels
    k_emb, k_ids, k_pos, k_beta, k_w1, k_w2 = jax.random.split(key, 6)

    # TODO(synk): the pretrained 'bert-base-uncased' encoder (AutoModel) cannot
    # be reproduced in-script; it is replaced by a deterministic embedding
    # lookup surrogate that yields last_hidden_state. Dropout (p=0.1) is the
    # identity in inference mode.
    input_ids = jax.random.randint(k_ids, (B, S), 0, V)
    attention_mask = jnp.ones((B, S), dtype=jnp.float32)
    emb_table = jax.random.normal(k_emb, (V, H), dtype=jnp.float32) * 0.02
    # Hidden states stored in bf16: halves the dominant HBM traffic; all math
    # inside the kernel accumulates in f32.
    last_hidden_state = (emb_table[input_ids]
                         * attention_mask[..., None]).astype(jnp.bfloat16)

    # position vector: one-hot of the target token position per example
    # (kept general — the kernel implements the full torch.bmm semantics).
    tgt_pos = jax.random.randint(k_pos, (B,), 0, S)
    position = jax.nn.one_hot(tgt_pos, S, dtype=jnp.float32)          # (B, S)
    # beta mask: 1 for valid positions, 0 masked; keep >=1 unmasked per row.
    beta = (jax.random.uniform(k_beta, (B, S)) > 0.2).astype(jnp.float32)
    beta = beta.at[:, 0].set(1.0)

    # Xavier-uniform linear_1 (H x 2H) and linear_2 (L x H), zero biases,
    # stored pre-transposed as (in, out).
    bound1 = (6.0 / (2 * H + H)) ** 0.5
    w1t = jax.random.uniform(k_w1, (2 * H, H), jnp.float32, -bound1, bound1)
    b1 = jnp.zeros((1, H), jnp.float32)
    bound2 = (6.0 / (H + L)) ** 0.5
    w2t = jax.random.uniform(k_w2, (H, L), jnp.float32, -bound2, bound2)
    b2 = jnp.zeros((1, L), jnp.float32)

    out = frame_classifier_head(last_hidden_state, position, beta,
                                w1t, b1, w2t, b2, b_tile=8)
    out = jax.block_until_ready(out)

    # Pure-JAX reference of the same head, built from the exact tensors the
    # kernel receives (bf16 hidden states, bf16-rounded weights), computed in
    # f32 — so the tolerance only has to absorb the kernel's internal bf16
    # MXU-operand casts and the approximate softmax reciprocal.
    h32 = last_hidden_state.astype(jnp.float32)
    w1_q = w1t.astype(jnp.bfloat16).astype(jnp.float32)
    w2_q = w2t.astype(jnp.bfloat16).astype(jnp.float32)
    target = jnp.einsum('bsh,bs->bh', h32, position)
    scores = jnp.einsum('bsh,bh->bs', h32, target)
    masked = jnp.where(beta == 0.0, -1e18, scores)
    align = jax.nn.softmax(masked, axis=-1)
    context = jnp.einsum('bsh,bs->bh', h32, align)
    x = jnp.concatenate([context, target], axis=-1)
    ref = jnp.tanh(x @ w1_q + b1) @ w2_q + b2
    assert out.shape == (B, L)
    assert jnp.allclose(out, ref, atol=5e-3, rtol=2e-2), (
        float(jnp.max(jnp.abs(out - ref))))

    print("KERNEL_OK")
</pallas_src>

<mosaic_0001>
module attributes {stable_mosaic.version = 11 : i64} {
  func.func @frame_classifier_kernel(%arg0: i32, %arg1: memref<8x8x128xbf16, #tpu.memory_space<vmem>>, %arg2: memref<8x8xf32, #tpu.memory_space<vmem>>, %arg3: memref<8x8xf32, #tpu.memory_space<vmem>>, %arg4: memref<128x128xbf16, #tpu.memory_space<vmem>>, %arg5: memref<128x128xbf16, #tpu.memory_space<vmem>>, %arg6: memref<1x128xf32, #tpu.memory_space<vmem>>, %arg7: memref<128x16xbf16, #tpu.memory_space<vmem>>, %arg8: memref<1x16xf32, #tpu.memory_space<vmem>>, %arg9: memref<8x16xf32, #tpu.memory_space<vmem>>) attributes {dimension_semantics = [#tpu.dimension_semantics<parallel>], iteration_bounds = array<i64: 4>, scalar_prefetch = 0 : i64, scratch_operands = 0 : i64, tpu.core_type = #tpu.core_type<tc>, window_params = [{transform_indices = @transform_0, window_bounds = array<i64: 8, 8, 128>}, {transform_indices = @transform_1, window_bounds = array<i64: 8, 8>}, {transform_indices = @transform_2, window_bounds = array<i64: 8, 8>}, {pipeline_mode = #tpu.pipeline_mode<synchronous>, transform_indices = @transform_3, window_bounds = array<i64: 128, 128>}, {pipeline_mode = #tpu.pipeline_mode<synchronous>, transform_indices = @transform_4, window_bounds = array<i64: 128, 128>}, {pipeline_mode = #tpu.pipeline_mode<synchronous>, transform_indices = @transform_5, window_bounds = array<i64: 1, 128>}, {pipeline_mode = #tpu.pipeline_mode<synchronous>, transform_indices = @transform_6, window_bounds = array<i64: 128, 16>}, {pipeline_mode = #tpu.pipeline_mode<synchronous>, transform_indices = @transform_7, window_bounds = array<i64: 1, 16>}, {transform_indices = @transform_8, window_bounds = array<i64: 8, 16>}]} {
    %c0 = arith.constant 0 : index
    %c0_0 = arith.constant 0 : index
    %c0_1 = arith.constant 0 : index
    %0 = vector.load %arg1[%c0, %c0_0, %c0_1] : memref<8x8x128xbf16, #tpu.memory_space<vmem>>, vector<8x8x128xbf16>
    %c0_2 = arith.constant 0 : index
    %c0_3 = arith.constant 0 : index
    %1 = vector.load %arg2[%c0_2, %c0_3] : memref<8x8xf32, #tpu.memory_space<vmem>>, vector<8x8xf32>
    %c0_4 = arith.constant 0 : index
    %c0_5 = arith.constant 0 : index
    %2 = vector.load %arg3[%c0_4, %c0_5] : memref<8x8xf32, #tpu.memory_space<vmem>>, vector<8x8xf32>
    %3 = vector.shape_cast %1 : vector<8x8xf32> to vector<8x8x1xf32>
    %4 = arith.extf %0 : vector<8x8x128xbf16> to vector<8x8x128xf32>
    %5 = vector.broadcast %3 : vector<8x8x1xf32> to vector<8x8x128xf32>
    %6 = arith.mulf %4, %5 : vector<8x8x128xf32>
    %cst = arith.constant dense<0.000000e+00> : vector<8x128xf32>
    %7 = vector.multi_reduction <add>, %6, %cst [1] : vector<8x8x128xf32> to vector<8x128xf32>
    %8 = vector.shape_cast %7 : vector<8x128xf32> to vector<8x1x128xf32>
    %9 = arith.extf %0 : vector<8x8x128xbf16> to vector<8x8x128xf32>
    %10 = vector.broadcast %8 : vector<8x1x128xf32> to vector<8x8x128xf32>
    %11 = arith.mulf %9, %10 : vector<8x8x128xf32>
    %cst_6 = arith.constant dense<0.000000e+00> : vector<8x8xf32>
    %12 = vector.multi_reduction <add>, %11, %cst_6 [2] : vector<8x8x128xf32> to vector<8x8xf32>
    %cst_7 = arith.constant 0.000000e+00 : f32
    %13 = vector.broadcast %cst_7 : f32 to vector<8x8xf32>
    %14 = arith.cmpf oeq, %2, %13 : vector<8x8xf32>
    %cst_8 = arith.constant -9.99999984E+17 : f32
    %15 = vector.broadcast %cst_8 : f32 to vector<8x8xf32>
    %16 = arith.select %14, %15, %12 : vector<8x8xi1>, vector<8x8xf32>
    %cst_9 = arith.constant dense<0xFF800000> : vector<8xf32>
    %17 = vector.multi_reduction <maximumf>, %16, %cst_9 [1] : vector<8x8xf32> to vector<8xf32>
    %18 = vector.shape_cast %17 : vector<8xf32> to vector<8x1xf32>
    %19 = vector.broadcast %18 : vector<8x1xf32> to vector<8x8xf32>
    %20 = arith.subf %16, %19 : vector<8x8xf32>
    %21 = math.exp %20 : vector<8x8xf32>
    %cst_10 = arith.constant dense<0.000000e+00> : vector<8xf32>
    %22 = vector.multi_reduction <add>, %21, %cst_10 [1] : vector<8x8xf32> to vector<8xf32>
    %23 = vector.shape_cast %22 : vector<8xf32> to vector<8x1xf32>
    %24 = tpu.reciprocal %23 {approx = true} : vector<8x1xf32> -> vector<8x1xf32>
    %25 = vector.broadcast %24 : vector<8x1xf32> to vector<8x8xf32>
    %26 = arith.mulf %21, %25 : vector<8x8xf32>
    %27 = vector.shape_cast %26 : vector<8x8xf32> to vector<8x8x1xf32>
    %28 = arith.extf %0 : vector<8x8x128xbf16> to vector<8x8x128xf32>
    %29 = vector.broadcast %27 : vector<8x8x1xf32> to vector<8x8x128xf32>
    %30 = arith.mulf %28, %29 : vector<8x8x128xf32>
    %cst_11 = arith.constant dense<0.000000e+00> : vector<8x128xf32>
    %31 = vector.multi_reduction <add>, %30, %cst_11 [1] : vector<8x8x128xf32> to vector<8x128xf32>
    %32 = arith.truncf %31 : vector<8x128xf32> to vector<8x128xbf16>
    %33 = arith.truncf %7 : vector<8x128xf32> to vector<8x128xbf16>
    %c0_12 = arith.constant 0 : index
    %c0_13 = arith.constant 0 : index
    %34 = vector.load %arg4[%c0_12, %c0_13] : memref<128x128xbf16, #tpu.memory_space<vmem>>, vector<128x128xbf16>
    %cst_14 = arith.constant dense<0.000000e+00> : vector<8x128xf32>
    %35 = tpu.matmul %32, %34, %cst_14 {dimension_numbers = #tpu.dot_dimension_numbers<[1], [0], [0], [1], [0, 0, 1, 1], [], []>} : vector<8x128xbf16>, vector<128x128xbf16>, vector<8x128xf32> -> vector<8x128xf32>
    %c0_15 = arith.constant 0 : index
    %c0_16 = arith.constant 0 : index
    %36 = vector.load %arg5[%c0_15, %c0_16] : memref<128x128xbf16, #tpu.memory_space<vmem>>, vector<128x128xbf16>
    %cst_17 = arith.constant dense<0.000000e+00> : vector<8x128xf32>
    %37 = tpu.matmul %33, %36, %cst_17 {dimension_numbers = #tpu.dot_dimension_numbers<[1], [0], [0], [1], [0, 0, 1, 1], [], []>} : vector<8x128xbf16>, vector<128x128xbf16>, vector<8x128xf32> -> vector<8x128xf32>
    %38 = arith.addf %35, %37 : vector<8x128xf32>
    %c0_18 = arith.constant 0 : index
    %c0_19 = arith.constant 0 : index
    %39 = vector.load %arg6[%c0_18, %c0_19] : memref<1x128xf32, #tpu.memory_space<vmem>>, vector<1x128xf32>
    %40 = vector.broadcast %39 : vector<1x128xf32> to vector<8x128xf32>
    %41 = arith.addf %38, %40 : vector<8x128xf32>
    %42 = math.tanh %41 : vector<8x128xf32>
    %43 = arith.truncf %42 : vector<8x128xf32> to vector<8x128xbf16>
    %c0_20 = arith.constant 0 : index
    %c0_21 = arith.constant 0 : index
    %44 = vector.load %arg7[%c0_20, %c0_21] : memref<128x16xbf16, #tpu.memory_space<vmem>>, vector<128x16xbf16>
    %cst_22 = arith.constant dense<0.000000e+00> : vector<8x16xf32>
    %45 = tpu.matmul %43, %44, %cst_22 {dimension_numbers = #tpu.dot_dimension_numbers<[1], [0], [0], [1], [0, 0, 1, 1], [], []>} : vector<8x128xbf16>, vector<128x16xbf16>, vector<8x16xf32> -> vector<8x16xf32>
    %c0_23 = arith.constant 0 : index
    %c0_24 = arith.constant 0 : index
    %46 = vector.load %arg8[%c0_23, %c0_24] : memref<1x16xf32, #tpu.memory_space<vmem>>, vector<1x16xf32>
    %47 = vector.broadcast %46 : vector<1x16xf32> to vector<8x16xf32>
    %48 = arith.addf %45, %47 : vector<8x16xf32>
    %c0_25 = arith.constant 0 : index
    %c0_26 = arith.constant 0 : index
    %49 = vector.load %arg9[%c0_25, %c0_26] : memref<8x16xf32, #tpu.memory_space<vmem>>, vector<8x16xf32>
    tpu.vector_store %arg9[%c0_25, %c0_26], %48 {strides = array<i32>} : memref<8x16xf32, #tpu.memory_space<vmem>>, vector<8x16xf32>,
    return
  }
  func.func @transform_0(%arg0: i32) -> (i32, i32, i32) {
    %c0_i32 = arith.constant 0 : i32
    %c0_i32_0 = arith.constant 0 : i32
    %c0_i32_1 = arith.constant 0 : i32
    return %arg0, %c0_i32, %c0_i32_0 : i32, i32, i32
  }
  func.func @transform_1(%arg0: i32) -> (i32, i32) {
    %c0_i32 = arith.constant 0 : i32
    %c0_i32_0 = arith.constant 0 : i32
    return %arg0, %c0_i32 : i32, i32
  }
  func.func @transform_2(%arg0: i32) -> (i32, i32) {
    %c0_i32 = arith.constant 0 : i32
    %c0_i32_0 = arith.constant 0 : i32
    return %arg0, %c0_i32 : i32, i32
  }
  func.func @transform_3(%arg0: i32) -> (i32, i32) {
    %c0_i32 = arith.constant 0 : i32
    %c0_i32_0 = arith.constant 0 : i32
    %c0_i32_1 = arith.constant 0 : i32
    return %c0_i32, %c0_i32_0 : i32, i32
  }
  func.func @transform_4(%arg0: i32) -> (i32, i32) {
    %c0_i32 = arith.constant 0 : i32
    %c0_i32_0 = arith.constant 0 : i32
    %c0_i32_1 = arith.constant 0 : i32
    return %c0_i32, %c0_i32_0 : i32, i32
  }
  func.func @transform_5(%arg0: i32) -> (i32, i32) {
    %c0_i32 = arith.constant 0 : i32
    %c0_i32_0 = arith.constant 0 : i32
    %c0_i32_1 = arith.constant 0 : i32
    return %c0_i32, %c0_i32_0 : i32, i32
  }
  func.func @transform_6(%arg0: i32) -> (i32, i32) {
    %c0_i32 = arith.constant 0 : i32
    %c0_i32_0 = arith.constant 0 : i32
    %c0_i32_1 = arith.constant 0 : i32
    return %c0_i32, %c0_i32_0 : i32, i32
  }
  func.func @transform_7(%arg0: i32) -> (i32, i32) {
    %c0_i32 = arith.constant 0 : i32
    %c0_i32_0 = arith.constant 0 : i32
    %c0_i32_1 = arith.constant 0 : i32
    return %c0_i32, %c0_i32_0 : i32, i32
  }
  func.func @transform_8(%arg0: i32) -> (i32, i32) {
    %c0_i32 = arith.constant 0 : i32
    %c0_i32_0 = arith.constant 0 : i32
    return %arg0, %c0_i32 : i32, i32
  }
}

</mosaic_0001>

<bundles_post_ra>
// kernel: tpu_custom_call.1
= control target key start
LH: loop header
LB: loop body
LE: loop exit
PB: predicated region body
PF: predicated region fallthrough
CT: control target
= control target key end

     0   :  { %13 = vsyncpa [#allocation3], 0  ;;  %s1785_s0 = inlined_call_operand.vmem [shape: bf16[32,8,128], index: 0, kind: input, shape index: {}]   ;;  %s1786_s1 = inlined_call_operand.vmem [shape: f32[32,8], index: 1, kind: input, shape index: {}]   ;;  %s1787_s2 = inlined_call_operand.vmem [shape: f32[32,8], index: 2, kind: input, shape index: {}]   ;;  %s1788_s3 = inlined_call_operand.hbm [shape: bf16[128,128], index: 3, kind: input, shape index: {}]   ;;  %s1789_s4 = inlined_call_operand.hbm [shape: bf16[128,128], index: 4, kind: input, shape index: {}]   ;;  %s1790_s5 = inlined_call_operand.vmem [shape: f32[1,128], index: 5, kind: input, shape index: {}]   ;;  %s1791_s6 = inlined_call_operand.vmem [shape: bf16[128,16], index: 6, kind: input, shape index: {}]   ;;  %s1792_s7 = inlined_call_operand.vmem [shape: f32[1,16], index: 7, kind: input, shape index: {}]   ;;  %s1793_s8 = inlined_call_operand.vmem [shape: f32[32,16], index: 8, kind: output, shape index: {}]  }
   0x1   :  { %14 = vsyncpa [#allocation5], 0  ;;  %s1534_s27 = smov 0  }
   0x2 LB: > { %s1540_s28 = sadd.s32 4294967295, %s1481_s27   ;;  %p1206_p0 = scmp.ge.s32.totalorder %s1481_s27, 1  ;;  %s1481_s27 = sphi %s1534_s27, %s20_s27  }
   0x3   : > { %p234_p1 = scmp.lt.s32.totalorder %s1481_s27, 5  ;;  %s1483_s29 = smov [#allocation2]  }
   0x4   : > { %s246_s30 = sshll.u32 %s1483_s29, 4  ;;  %p1367_p3 = scmp.eq.s32.totalorder %s1540_s28, 0  ;;  %s247_s30 = int_to_ptr.vmem [resolvable:$true] %s246_s30 }
   0x5   : > { %p1544_p2 = pnand %p1206_p0, %p234_p1  ;;  %s1484_s10 = smov [#allocation4]  }
   0x6   : > { %s259_s11 = sshll.u32 %s1484_s10, 4  ;;  %s1426_s13 = scalar_lea.vmem %s247_s30, 1024  ;;  %s260_s11 = int_to_ptr.vmem [resolvable:$true] %s259_s11 }
   0x7   : > { %p1360_p4 = pneg %p1544_p2  ;;  %p1427_p7 = scmp.ne.s32.totalorder %s247_s30, %s1426_s13 }
   0x8   : > { %p1434_p10 = scmp.lt.s32.totalorder %s247_s30, %s247_s30  ;;  %p1435_p11 = scmp.lt.s32.totalorder %s1426_s13, %s1426_s13 }
   0x9   : > { %p1553_p5 = pnand %p1367_p3, %p1360_p4 }
   0xa   : > { %p1436_p12 = por %p1435_p11, %p1434_p10 }
   0xb   : > { %p1417_p6 = pneg %p1553_p5 }
   0xd   : > { %p1429_p8 = pnand %p1427_p7, %p1417_p6 }
   0xf   : > { %p1430_p9 = pneg %p1429_p8 }
  0x11   : > { %p1437_p13 = pnand %p1436_p12, %p1430_p9 }
  0x13   : > { %1440 = shalt.err (!%p1437_p13)
}
  0x14   : > { %s1485_s14 = smov 64   ;;  %s1486_s15 = smov 4  }
  0x15   : > { %1363 = dma.hbm_to_vmem [thread:$0]  (!%p1553_p5), %s1788_s3, 1024, %s247_s30, [#allocation3], %s1485_s14, %s1485_s14, %s1486_s15  }
  0x16   : > { %s1452_s18 = scalar_lea.vmem %s260_s11, 1024  ;;  %p1460_p7 = scmp.lt.s32.totalorder %s260_s11, %s260_s11 }
  0x17   : > { %p1453_p0 = scmp.ne.s32.totalorder %s260_s11, %s1452_s18  ;;  %p1461_p8 = scmp.lt.s32.totalorder %s1452_s18, %s1452_s18 }
  0x19   : > { %p1455_p1 = pnand %p1453_p0, %p1417_p6  ;;  %p1462_p10 = por %p1461_p8, %p1460_p7 }
  0x1b   : > { %p1456_p4 = pneg %p1455_p1 }
  0x1d   : > { %p1463_p9 = pnand %p1462_p10, %p1456_p4 }
  0x1f   : > { %1466 = shalt.err (!%p1463_p9)
}
  0x20   : > { %1366 = dma.hbm_to_vmem [thread:$0]  (!%p1553_p5), %s1789_s4, 1024, %s260_s11, [#allocation5], %s1485_s14, %s1485_s14, %s1486_s15  }
  0x21   : > { %307 = sbr.rel (%p1544_p2) target bundleno = 1218 (0x4c2), region = 52 }
  0x26   : > { %1472 = dma.done.wait (%p1367_p3), [#allocation3], 1024  }
  0x27   : > { %1474 = vsyncadd (%p1367_p3), [#allocation3], 4294966272 }
  0x28   : > { %1476 = dma.done.wait (%p1367_p3), [#allocation5], 1024  }
  0x29   : > { %1478 = vsyncadd (%p1367_p3), [#allocation5], 4294966272  ;;  %p358_p6 = scmp.lt.s32.totalorder %s1540_s28, 3  ;;  %v381_v0 = vlaneseq  ;;  %v1487_v1 = vmov 0.0   ;;  %v1385_v10 = vld [vmem:[#allocation4 + $0x38] sm:$0xff]   ;;  %v1386_v15 = vld [vmem:[#allocation4 + $0x30] sm:$0xff]  }
  0x2a   : > { %1292 = vmatprep.subr.bf16.mxu0 %v1487_v1  ;;  %1312 = vmatprep.subr.bf16.mxu1 %v1487_v1  ;;  %v1387_v20 = vld [vmem:[#allocation4 + $0x28] sm:$0xff]   ;;  %v1388_v23 = vld [vmem:[#allocation4 + $0x20] sm:$0xff]   ;;  %v1389_v24 = vld [vmem:[#allocation4 + $0x18] sm:$0xff]   ;;  %vm1488_vm0 = vmmov 0   ;;  %s1213_s26 = sshll.u32 %s1540_s28, 3  ;;  %vm568_vm1 = vcmask 1041409  }
  0x2b   : > { %s359_s21 = scalar_select %p358_p6, %s1540_s28, 3  ;;  %v1589_v2 = vshrl.u32 %v381_v0, 7  ;;  %1293 = vmatpush3.bf16.msra.mxu0 %v1385_v10  ;;  %v1390_v25 = vld [vmem:[#allocation4 + $0x10] sm:$0xff]   ;;  %v1391_v26 = vld [vmem:[#allocation4 + $0x8] sm:$0xff]   ;;  %1308 = vmatprep.mubr.msk.bf16.mxu0 %vm1488_vm0, %v1487_v1  ;;  %v535_v27 = vand.u32 127, %v381_v0  ;;  %v1392_v29 = vld [vmem:[#allocation4] sm:$0xff]  }
  0x2c   : > { %1294 = vmatprep.subr.bf16.mxu0 %v1487_v1  ;;  %1328 = vmatprep.mubr.msk.bf16.mxu1 %vm1488_vm0, %v1487_v1  ;;  %p353_p2 = scmp.lt.s32.totalorder %s1213_s26, 31  ;;  %vm570_vm2 = vcmask 1042434   ;;  %vm572_vm3 = vcmask 1043459   ;;  %vm574_vm4 = vcmask 1044484   ;;  %vm576_vm5 = vcmask 1045509  }
  0x2d   : > { %s1591_s22 = sshll.u32 %s359_s21, 3  ;;  %v397_v3 = vsub.s32 2, %v1589_v2  ;;  %v383_v4 = vsub.s32 0, %v1589_v2  ;;  %v404_v5 = vsub.s32 3, %v1589_v2  ;;  %v390_v6 = vsub.s32 1, %v1589_v2 }
  0x2e   : > { %s361_s25 = scalar_lea.vmem %s1786_s1, %s1591_s22  ;;  %v418_v13 = vsub.s32 5, %v1589_v2  ;;  %v411_v14 = vsub.s32 4, %v1589_v2  ;;  %v432_v16 = vsub.s32 7, %v1589_v2  ;;  %v425_v17 = vsub.s32 6, %v1589_v2  ;;  %s1797_s26 = smov (!%p353_p2, %s1213_s26), 31 }
  0x2f   : > { %v379_v7 = vld [vmem:[%s361_s25] sm:$0xff]  ;;  %1295 = vmatpush3.bf16.msra.mxu0 %v1386_v15  ;;  %v1632_v28 = vsub.s32 %v535_v27, %v1589_v2  ;;  %s1214_s29 = sshll.u32 %s1797_s26, 2  ;;  %vm578_vm6 = vcmask 1046534   ;;  %vm580_vm7 = vcmask 1047559   ;;  %s365_s12 = scalar_lea.vmem %s1787_s2, %s1591_s22  ;;  %vm584_vm9 = vcmask 64512   ;;  %v1402_v2 = vld [vmem:[%s1791_s6 + $0x30] sm:$0xff]  }
  0x30   : > { %v398_v8 = vrot.slane %v379_v7, %v397_v3  ;;  %v384_v9 = vrot.slane %v379_v7, %v383_v4  ;;  %v405_v11 = vrot.slane %v379_v7, %v404_v5  ;;  %v391_v12 = vrot.slane %v379_v7, %v390_v6  ;;  %1296 = vmatprep.subr.bf16.mxu0 %v1487_v1  ;;  %s356_s10 = scalar_lea.vmem %s1785_s0, %s1214_s29  ;;  %s369_s15 = scalar_lea.vmem %s1793_s8, %s1591_s22 }
  0x31   : > { %v419_v18 = vrot.slane %v379_v7, %v418_v13  ;;  %v412_v19 = vrot.slane %v379_v7, %v411_v14  ;;  %v433_v21 = vrot.slane %v379_v7, %v432_v16  ;;  %v426_v22 = vrot.slane %v379_v7, %v425_v17  ;;  %v1262_v30 = vld [vmem:[%s356_s10 + $0x8] sm:$0xff]   ;;  %v1247_v31 = vld [vmem:[%s356_s10] sm:$0xff]   ;;  %v1263_v42 = vld [vmem:[%s356_s10 + $0x10] sm:$0xff]  }
  0x32   : > { %400 = vbcast.lane.b32.xlu1 %v398_v8, 256  ;;  %386 = vbcast.lane.b32.xlu0 %v384_v9, 256  ;;  %v1640_v32 = vunpack.c.l.bf16 %v1262_v30  ;;  %v1642_v33 = vunpack.c.l.bf16 %v1247_v31  ;;  %v1646_v38 = vunpack.c.h.bf16 %v1262_v30  ;;  %v1648_v39 = vunpack.c.h.bf16 %v1247_v31  ;;  %v1264_v49 = vld [vmem:[%s356_s10 + $0x18] sm:$0xff]  }
  0x33   : > { %1297 = vmatpush3.bf16.msra.mxu0 %v1387_v20  ;;  %v1652_v50 = vunpack.c.h.bf16 %v1263_v42  ;;  %v1654_v51 = vunpack.c.l.bf16 %v1263_v42  ;;  %v1656_v58 = vunpack.c.h.bf16 %v1264_v49  ;;  %v1658_v59 = vunpack.c.l.bf16 %v1264_v49 }
  0x34   : > { %1298 = vmatprep.subr.bf16.mxu0 %v1487_v1  ;;  %vm1103_vm10 = vcmask 130048  }
  0x36   : > { %407 = vbcast.lane.b32.xlu1 %v405_v11, 256  ;;  %393 = vbcast.lane.b32.xlu0 %v391_v12, 256 }
  0x37   : > { %1299 = vmatpush3.bf16.msra.mxu0 %v1388_v23 }
  0x38   : > { %1300 = vmatprep.subr.bf16.mxu0 %v1487_v1 }
  0x3a   : > { %421 = vbcast.lane.b32.xlu1 %v419_v18, 256  ;;  %414 = vbcast.lane.b32.xlu0 %v412_v19, 256 }
  0x3b   : > { %1301 = vmatpush3.bf16.msra.mxu0 %v1389_v24 }
  0x3c   : > { %1302 = vmatprep.subr.bf16.mxu0 %v1487_v1 }
  0x3e   : > { %435 = vbcast.lane.b32.xlu1 %v433_v21, 256  ;;  %428 = vbcast.lane.b32.xlu0 %v426_v22, 256 }
  0x3f   : > { %1303 = vmatpush3.bf16.msra.mxu0 %v1390_v25 }
  0x40   : > { %1304 = vmatprep.subr.bf16.mxu0 %v1487_v1 }
  0x43   : > { %1305 = vmatpush3.bf16.msra.mxu0 %v1391_v26 }
  0x44   : > { %1306 = vmatprep.subr.bf16.mxu0 %v1487_v1 }
  0x47   : > { %1307 = vmatpush3.bf16.msra.mxu0 %v1392_v29 }
  0x48   : > { %1332 = vmatprep.subr.bf16.mxu0 %v1487_v1 }
  0xa4   : > { %v401_v34 = vpop.permute.xlu1 %400  ;;  %v387_v35 = vpop.permute.xlu0 %386 }
  0xa5   : > { %v447_v36 = vmul.f32 %v1640_v32, %v401_v34  ;;  %v445_v37 = vmul.f32 %v1642_v33, %v387_v35 }
  0xa7   : > { %v465_v40 = vrot.slane %v447_v36, 4  ;;  %v453_v41 = vrot.slane %v445_v37, 4 }
  0xa8   : > { %v408_v43 = vpop.permute.xlu1 %407  ;;  %v394_v44 = vpop.permute.xlu0 %393 }
  0xa9   : > { %v466_v45 = vadd.f32 %v465_v40, %v447_v36  ;;  %v454_v46 = vadd.f32 %v453_v41, %v445_v37  ;;  %v448_v47 = vmul.f32 %v1646_v38, %v408_v43  ;;  %v446_v48 = vmul.f32 %v1648_v39, %v394_v44 }
  0xab   : > { %v467_v52 = vrot.slane %v466_v45, 2  ;;  %v455_v53 = vrot.slane %v454_v46, 2  ;;  %v471_v54 = vrot.slane %v448_v47, 4  ;;  %v459_v55 = vrot.slane %v446_v48, 4 }
  0xac   : > { %v422_v56 = vpop.permute.xlu1 %421  ;;  %v415_v57 = vpop.permute.xlu0 %414 }
  0xad   : > { %v468_v60 = vadd.f32 %v467_v52, %v466_v45  ;;  %v456_v61 = vadd.f32 %v455_v53, %v454_v46  ;;  %v472_v62 = vadd.f32 %v471_v54, %v448_v47  ;;  %v460_v63 = vadd.f32 %v459_v55, %v446_v48 }
  0xae   : > { %v450_v0 = vmul.f32 %v1652_v50, %v422_v56  ;;  %v449_v7 = vmul.f32 %v1654_v51, %v415_v57 }
  0xaf   : > { %v473_v8 = vrot.slane %v472_v62, 2  ;;  %v461_v9 = vrot.slane %v460_v63, 2  ;;  %v457_v10 = vrot.slane %v456_v61, 1  ;;  %v469_v11 = vrot.slane %v468_v60, 1 }
  0xb0   : > { %v483_v12 = vrot.slane %v450_v0, 4  ;;  %v477_v15 = vrot.slane %v449_v7, 4  ;;  %v436_v18 = vpop.permute.xlu1 %435  ;;  %v429_v19 = vpop.permute.xlu0 %428 }
  0xb1   : > { %v474_v20 = vadd.f32 %v473_v8, %v472_v62  ;;  %v462_v21 = vadd.f32 %v461_v9, %v460_v63  ;;  %v452_v22 = vmul.f32 %v1656_v58, %v436_v18  ;;  %v451_v23 = vmul.f32 %v1658_v59, %v429_v19 }
  0xb2   : > { %v484_v24 = vadd.f32 %v483_v12, %v450_v0  ;;  %v478_v25 = vadd.f32 %v477_v15, %v449_v7  ;;  %v458_v26 = vadd.f32 %v457_v10, %v456_v61  ;;  %v470_v27 = vadd.f32 %v469_v11, %v468_v60 }
  0xb3   : > { %v495_v29 = vrot.slane %v452_v22, 4  ;;  %v489_v30 = vrot.slane %v451_v23, 4  ;;  %v463_v31 = vrot.slane %v462_v21, 1  ;;  %v475_v37 = vrot.slane %v474_v20, 1 }
  0xb4   : > { %v485_v34 = vrot.slane %v484_v24, 2  ;;  %v479_v35 = vrot.slane %v478_v25, 2  ;;  %v501_v36 = vmul.f32 %v1642_v33, %v458_v26  ;;  %v716_v42 = vpack.c.bf16 %v458_v26, %v458_v26 }
  0xb5   : > { %v496_v40 = vadd.f32 %v495_v29, %v452_v22  ;;  %v490_v41 = vadd.f32 %v489_v30, %v451_v23  ;;  %v464_v43 = vadd.f32 %v463_v31, %v462_v21  ;;  %v718_v46 = vpack.c.bf16 %v470_v27, %v470_v27 }
  0xb6   : > { %v486_v44 = vadd.f32 %v485_v34, %v484_v24  ;;  %v480_v45 = vadd.f32 %v479_v35, %v478_v25  ;;  %509 = vadd.xlane.f32.xlu0 %v501_v36  ;;  %v503_v53 = vmul.f32 %v1640_v32, %v470_v27  ;;  %v476_v55 = vadd.f32 %v475_v37, %v474_v20 }
  0xb7   : > { %v497_v47 = vrot.slane %v496_v40, 2  ;;  %v491_v48 = vrot.slane %v490_v41, 2  ;;  %v502_v49 = vmul.f32 %v1648_v39, %v464_v43  ;;  %v717_v52 = vpack.c.bf16 %v464_v43, %v464_v43 }
  0xb8   : > { %v481_v54 = vrot.slane %v480_v45, 1  ;;  %v487_v56 = vrot.slane %v486_v44, 1  ;;  %v764_v61 = vunpack.c.l.b16 %v716_v42  ;;  %v766_v63 = vunpack.c.l.b16 %v718_v46 }
  0xb9   : > { %v498_v57 = vadd.f32 %v497_v47, %v496_v40  ;;  %v492_v60 = vadd.f32 %v491_v48, %v490_v41  ;;  %v765_v62 = vunpack.c.l.b16 %v717_v52  ;;  %511 = vadd.xlane.f32.xlu1 %v502_v49  ;;  %v719_v7 = vpack.c.bf16 %v476_v55, %v476_v55 }
  0xba   : > { %513 = vadd.xlane.f32.xlu0 %v503_v53  ;;  %v482_v0 = vadd.f32 %v481_v54, %v480_v45  ;;  %v488_v8 = vadd.f32 %v487_v56, %v486_v44  ;;  %v504_v10 = vmul.f32 %v1646_v38, %v476_v55 }
  0xbb   : > { %v772_v9 = vsel %vm568_vm1, %v765_v62, %v764_v61  ;;  %v493_v11 = vrot.slane %v492_v60, 1  ;;  %v499_v12 = vrot.slane %v498_v57, 1  ;;  %v767_v20 = vunpack.c.l.b16 %v719_v7 }
  0xbc   : > { %v773_v15 = vsel %vm570_vm2, %v766_v63, %v772_v9  ;;  %v505_v18 = vmul.f32 %v1654_v51, %v482_v0  ;;  %v720_v19 = vpack.c.bf16 %v482_v0, %v482_v0  ;;  %v721_v22 = vpack.c.bf16 %v488_v8, %v488_v8 }
  0xbd   : > { %v494_v21 = vadd.f32 %v493_v11, %v492_v60  ;;  %v500_v23 = vadd.f32 %v499_v12, %v498_v57  ;;  %v774_v25 = vsel %vm572_vm3, %v767_v20, %v773_v15  ;;  %v506_v30 = vmul.f32 %v1652_v50, %v488_v8  ;;  %v380_v8 = vld [vmem:[%s365_s12] sm:$0xff] }
  0xbe   : > { %v768_v24 = vunpack.c.l.b16 %v720_v19  ;;  %517 = vadd.xlane.f32.xlu1 %v505_v18  ;;  %515 = vadd.xlane.f32.xlu0 %v504_v10  ;;  %v769_v29 = vunpack.c.l.b16 %v721_v22  ;;  %vm525_vm8 = vcmp.eq.f32.partialorder %v380_v8, 0.0 }
  0xbf   : > { %v507_v26 = vmul.f32 %v1658_v59, %v494_v21  ;;  %v722_v27 = vpack.c.bf16 %v494_v21, %v494_v21  ;;  %v723_v31 = vpack.c.bf16 %v500_v23, %v500_v23  ;;  %v508_v41 = vmul.f32 %v1656_v58, %v500_v23 }
  0xc0   : > { %v775_v34 = vsel %vm574_vm4, %v768_v24, %v774_v25 }
  0xc1   : > { %v770_v35 = vunpack.c.l.b16 %v722_v27  ;;  %v771_v36 = vunpack.c.l.b16 %v723_v31  ;;  %v776_v37 = vsel %vm576_vm5, %v769_v29, %v775_v34 }
  0xc2   : > { %521 = vadd.xlane.f32.xlu1 %v507_v26  ;;  %519 = vadd.xlane.f32.xlu0 %v506_v30  ;;  %v1393_v30 = vld [vmem:[#allocation2 + $0x38] sm:$0xff]  }
  0xc3   : > { %v777_v40 = vsel %vm578_vm6, %v770_v35, %v776_v37  ;;  %1313 = vmatpush3.bf16.msra.mxu1 %v1393_v30  ;;  %v1394_v35 = vld [vmem:[#allocation2 + $0x30] sm:$0xff]  }
  0xc4   : > { %v778_v42 = vsel %vm580_vm7, %v771_v36, %v777_v40  ;;  %1314 = vmatprep.subr.bf16.mxu1 %v1487_v1  ;;  %v1395_v40 = vld [vmem:[#allocation2 + $0x28] sm:$0xff]  }
  0xc5   : > { %v779_v43 = vpack.c.b16 %v778_v42, %v778_v42 }
  0xc6   : > { %523 = vadd.xlane.f32.xlu0 %v508_v41 }
  0xc7   : > { %1309 = vmatmul.mubr.bf16.vlgmr.msra.gmra.mxu0 %v779_v43  ;;  %1315 = vmatpush3.bf16.msra.mxu1 %v1394_v35 }
  0xc8   : > { %1348 = vmatprep.mubr.msk.bf16.mxu0 %vm1488_vm0, %v1487_v1  ;;  %1316 = vmatprep.subr.bf16.mxu1 %v1487_v1 }
  0xcb   : > { %1317 = vmatpush3.bf16.msra.mxu1 %v1395_v40 }
  0xcc   : > { %1318 = vmatprep.subr.bf16.mxu1 %v1487_v1 }
 0x13f   : > { %v510_v44 = vpop.xlane.xlu0 %509 }
 0x140   : > { %v539_v48 = vrot.slane %v510_v44, %v1632_v28  ;;  %v1398_v44 = vld [vmem:[#allocation2 + $0x10] sm:$0xff]  }
 0x142   : > { %v512_v45 = vpop.xlane.xlu1 %511 }
 0x143   : > { %v543_v46 = vrot.slane %v512_v45, %v1632_v28  ;;  %v514_v47 = vpop.xlane.xlu0 %513  ;;  %v1400_v45 = vld [vmem:[#allocation2] sm:$0xff]  }
 0x144   : > { %v547_v49 = vrot.slane %v514_v47, %v1632_v28 }
 0x145   : > { %v569_v52 = vsel %vm568_vm1, %v543_v46, %v539_v48 }
 0x146   : > { %v571_v56 = vsel %vm570_vm2, %v547_v49, %v569_v52 }
 0x147   : > { %v518_v53 = vpop.xlane.xlu1 %517  ;;  %v516_v54 = vpop.xlane.xlu0 %515 }
 0x148   : > { %v551_v55 = vrot.slane %v516_v54, %v1632_v28  ;;  %v555_v57 = vrot.slane %v518_v53, %v1632_v28 }
 0x14a   : > { %v573_v60 = vsel %vm572_vm3, %v551_v55, %v571_v56 }
 0x14b   : > { %v522_v61 = vpop.xlane.xlu1 %521  ;;  %v520_v62 = vpop.xlane.xlu0 %519  ;;  %v575_v7 = vsel %vm574_vm4, %v555_v57, %v573_v60 }
 0x14c   : > { %v559_v63 = vrot.slane %v520_v62, %v1632_v28  ;;  %v563_v0 = vrot.slane %v522_v61, %v1632_v28 }
 0x14e   : > { %v577_v9 = vsel %vm576_vm5, %v559_v63, %v575_v7 }
 0x14f   : > { %v524_v10 = vpop.xlane.xlu0 %523  ;;  %v579_v12 = vsel %vm578_vm6, %v563_v0, %v577_v9 }
 0x150   : > { %v567_v11 = vrot.slane %v524_v10, %v1632_v28 }
 0x152   : > { %v581_v15 = vsel %vm580_vm7, %v567_v11, %v579_v12 }
 0x153   : > { %v583_v18 = vsel %vm525_vm8, -1e+18, %v581_v15 }
 0x154   : > { %v585_v19 = vsel %vm584_vm9, %v583_v18, -inf }
 0x155   : > { %586 = vmax.xlane.f32.xlu1 %v585_v19 }
 0x187   : > { %v1700_v20 = vpop.f32.mrf.mxu0 }
 0x189   : > { %v1310_v21 = vpop.f32.mrf.mxu0 }
 0x18b   : > { %v866_v22 = vpop.f32.mrf.mxu0 }
 0x18d   : > { %v1311_v23 = vpop.f32.mrf.mxu0 }
 0x1de   : > { %v587_v24 = vpop.xlane.xlu1 %586 }
 0x1df   : > { %v588_v25 = vsub.f32 %v583_v18, %v587_v24 }
 0x1e1   : > { %v589_v26 = vmul.f32 1.442695, %v588_v25 }
 0x1e3   : > { %1409 = vpow2.f32 %v589_v26 }
 0x1f0   : > { %v1410_v27 = vpop.eup %1409 }
 0x1f1   : > { %v591_v28 = vsel %vm584_vm9, %v1410_v27, 0.0 }
 0x1f2   : > { %592 = vadd.xlane.f32.xlu0 %v591_v28 }
 0x27b   : > { %v593_v29 = vpop.xlane.xlu0 %592 }
 0x27c   : > { %1411 = vrcp.f32 %v593_v29 }
 0x289   : > { %v1412_v31 = vpop.eup %1411 }
 0x28a   : > { %v595_v34 = vmul.f32 %v1412_v31, %v1410_v27 }
 0x28c   : > { %v606_v36 = vrot.slane %v595_v34, %v390_v6  ;;  %v599_v37 = vrot.slane %v595_v34, %v383_v4  ;;  %v627_v41 = vrot.slane %v595_v34, %v411_v14  ;;  %v613_v42 = vrot.slane %v595_v34, %v397_v3  ;;  %v1396_v6 = vld [vmem:[#allocation2 + $0x20] sm:$0xff]   ;;  %v1397_v14 = vld [vmem:[#allocation2 + $0x18] sm:$0xff]  }
 0x28d   : > { %v641_v4 = vrot.slane %v595_v34, %v425_v17  ;;  %v620_v43 = vrot.slane %v595_v34, %v404_v5  ;;  %1319 = vmatpush3.bf16.msra.mxu1 %v1396_v6  ;;  %v634_v3 = vrot.slane %v595_v34, %v418_v13  ;;  %v648_v17 = vrot.slane %v595_v34, %v432_v16  ;;  %v1399_v5 = vld [vmem:[#allocation2 + $0x8] sm:$0xff]   ;;  %v1401_v13 = vld [vmem:[%s1791_s6 + $0x38] sm:$0xff]  }
 0x28e   : > { %608 = vbcast.lane.b32.xlu0 %v606_v36, 256  ;;  %601 = vbcast.lane.b32.xlu1 %v599_v37, 256  ;;  %v1403_v16 = vld [vmem:[%s1791_s6 + $0x28] sm:$0xff]  }
 0x28f   : > { %1320 = vmatprep.subr.bf16.mxu1 %v1487_v1  ;;  %1333 = vmatpush3.bf16.msra.mxu0 %v1401_v13 }
 0x290   : > { %1334 = vmatprep.subr.bf16.mxu0 %v1487_v1 }
 0x291   : > { %1321 = vmatpush3.bf16.msra.mxu1 %v1397_v14 }
 0x292   : > { %629 = vbcast.lane.b32.xlu0 %v627_v41, 256  ;;  %615 = vbcast.lane.b32.xlu1 %v613_v42, 256 }
 0x293   : > { %1322 = vmatprep.subr.bf16.mxu1 %v1487_v1  ;;  %1335 = vmatpush3.bf16.msra.mxu0 %v1402_v2 }
 0x294   : > { %1336 = vmatprep.subr.bf16.mxu0 %v1487_v1 }
 0x295   : > { %1323 = vmatpush3.bf16.msra.mxu1 %v1398_v44 }
 0x296   : > { %643 = vbcast.lane.b32.xlu0 %v641_v4, 256  ;;  %622 = vbcast.lane.b32.xlu1 %v620_v43, 256 }
 0x297   : > { %1324 = vmatprep.subr.bf16.mxu1 %v1487_v1  ;;  %1337 = vmatpush3.bf16.msra.mxu0 %v1403_v16 }
 0x298   : > { %1338 = vmatprep.subr.bf16.mxu0 %v1487_v1 }
 0x299   : > { %1325 = vmatpush3.bf16.msra.mxu1 %v1399_v5 }
 0x29a   : > { %636 = vbcast.lane.b32.xlu1 %v634_v3, 256  ;;  %1326 = vmatprep.subr.bf16.mxu1 %v1487_v1 }
 0x29d   : > { %1327 = vmatpush3.bf16.msra.mxu1 %v1400_v45 }
 0x29e   : > { %650 = vbcast.lane.b32.xlu1 %v648_v17, 256 }
 0x300   : > { %v609_v46 = vpop.permute.xlu0 %608  ;;  %v602_v47 = vpop.permute.xlu1 %601 }
 0x301   : > { %v653_v48 = vmul.f32 %v1648_v39, %v609_v46  ;;  %v652_v49 = vmul.f32 %v1642_v33, %v602_v47 }
 0x303   : > { %v666_v52 = vrot.slane %v653_v48, 4  ;;  %v660_v53 = vrot.slane %v652_v49, 4 }
 0x304   : > { %v630_v54 = vpop.permute.xlu0 %629  ;;  %v616_v55 = vpop.permute.xlu1 %615 }
 0x305   : > { %v667_v56 = vadd.f32 %v666_v52, %v653_v48  ;;  %v661_v57 = vadd.f32 %v660_v53, %v652_v49  ;;  %v656_v60 = vmul.f32 %v1654_v51, %v630_v54  ;;  %v654_v61 = vmul.f32 %v1640_v32, %v616_v55 }
 0x307   : > { %v668_v62 = vrot.slane %v667_v56, 2  ;;  %v662_v63 = vrot.slane %v661_v57, 2  ;;  %v684_v0 = vrot.slane %v656_v60, 4  ;;  %v672_v7 = vrot.slane %v654_v61, 4 }
 0x308   : > { %v644_v8 = vpop.permute.xlu0 %643  ;;  %v623_v9 = vpop.permute.xlu1 %622 }
 0x309   : > { %v669_v10 = vadd.f32 %v668_v62, %v667_v56  ;;  %v663_v39 = vadd.f32 %v662_v63, %v661_v57  ;;  %v685_v11 = vadd.f32 %v684_v0, %v656_v60  ;;  %v673_v33 = vadd.f32 %v672_v7, %v654_v61 }
 0x30a   : > { %v658_v12 = vmul.f32 %v1658_v59, %v644_v8  ;;  %v655_v15 = vmul.f32 %v1646_v38, %v623_v9 }
 0x30b   : > { %v670_v18 = vrot.slane %v669_v10, 1  ;;  %v664_v19 = vrot.slane %v663_v39, 1  ;;  %v686_v21 = vrot.slane %v685_v11, 2  ;;  %v674_v51 = vrot.slane %v673_v33, 2 }
 0x30c   : > { %v696_v22 = vrot.slane %v658_v12, 4  ;;  %v678_v32 = vrot.slane %v655_v15, 4  ;;  %v637_v23 = vpop.permute.xlu1 %636 }
 0x30d   : > { %v671_v24 = vadd.f32 %v670_v18, %v669_v10  ;;  %v665_v25 = vadd.f32 %v664_v19, %v663_v39  ;;  %v687_v26 = vadd.f32 %v686_v21, %v685_v11  ;;  %v675_v27 = vadd.f32 %v674_v51, %v673_v33  ;;  %v1404_v21 = vld [vmem:[%s1791_s6 + $0x20] sm:$0xff]   ;;  %v1405_v51 = vld [vmem:[%s1791_s6 + $0x18] sm:$0xff]  }
 0x30e   : > { %v697_v28 = vadd.f32 %v696_v22, %v658_v12  ;;  %v679_v29 = vadd.f32 %v678_v32, %v655_v15  ;;  %v657_v30 = vmul.f32 %v1652_v50, %v637_v23  ;;  %1339 = vmatpush3.bf16.msra.mxu0 %v1404_v21  ;;  %v1406_v22 = vld [vmem:[%s1791_s6 + $0x10] sm:$0xff]   ;;  %v1407_v32 = vld [vmem:[%s1791_s6 + $0x8] sm:$0xff]   ;;  %v1408_v23 = vld [vmem:[%s1791_s6] sm:$0xff]  }
 0x30f   : > { %v676_v31 = vrot.slane %v675_v27, 1  ;;  %v709_v36 = vpack.c.bf16 %v671_v24, %v671_v24  ;;  %v708_v37 = vpack.c.bf16 %v665_v25, %v665_v25  ;;  %v688_v40 = vrot.slane %v687_v26, 1  ;;  %1340 = vmatprep.subr.bf16.mxu0 %v1487_v1  ;;  %v1234_v25 = vld [vmem:[%s1790_s5] ss:$0 sm:$0xff] }
 0x310   : > { %v698_v34 = vrot.slane %v697_v28, 2  ;;  %v680_v59 = vrot.slane %v679_v29, 2  ;;  %v690_v35 = vrot.slane %v657_v30, 4  ;;  %v651_v38 = vpop.permute.xlu1 %650 }
 0x311   : > { %v677_v41 = vadd.f32 %v676_v31, %v675_v27  ;;  %v659_v43 = vmul.f32 %v1656_v58, %v651_v38  ;;  %v878_v5 = vunpack.c.l.b16 %v709_v36  ;;  %v689_v50 = vadd.f32 %v688_v40, %v687_v26 }
 0x312   : > { %v699_v42 = vadd.f32 %v698_v34, %v697_v28  ;;  %v681_v6 = vadd.f32 %v680_v59, %v679_v29  ;;  %v691_v4 = vadd.f32 %v690_v35, %v657_v30  ;;  %v877_v13 = vunpack.c.l.b16 %v708_v37  ;;  %1341 = vmatpush3.bf16.msra.mxu0 %v1405_v51 }
 0x313   : > { %v710_v14 = vpack.c.bf16 %v677_v41, %v677_v41  ;;  %v702_v17 = vrot.slane %v659_v43, 4  ;;  %v712_v53 = vpack.c.bf16 %v689_v50, %v689_v50  ;;  %1342 = vmatprep.subr.bf16.mxu0 %v1487_v1 }
 0x314   : > { %v682_v3 = vrot.slane %v681_v6, 1  ;;  %v692_v44 = vrot.slane %v691_v4, 2  ;;  %v700_v45 = vrot.slane %v699_v42, 1  ;;  %v885_v55 = vsel %vm568_vm1, %v878_v5, %v877_v13 }
 0x315   : > { %v703_v46 = vadd.f32 %v702_v17, %v659_v43  ;;  %v879_v47 = vunpack.c.l.b16 %v710_v14  ;;  %v881_v0 = vunpack.c.l.b16 %v712_v53 }
 0x316   : > { %v683_v2 = vadd.f32 %v682_v3, %v681_v6  ;;  %v693_v16 = vadd.f32 %v692_v44, %v691_v4  ;;  %v701_v54 = vadd.f32 %v700_v45, %v699_v42  ;;  %1343 = vmatpush3.bf16.msra.mxu0 %v1406_v22 }
 0x317   : > { %v704_v52 = vrot.slane %v703_v46, 2  ;;  %v886_v60 = vsel %vm570_vm2, %v879_v47, %v885_v55  ;;  %1344 = vmatprep.subr.bf16.mxu0 %v1487_v1 }
 0x318   : > { %v711_v48 = vpack.c.bf16 %v683_v2, %v683_v2  ;;  %v694_v49 = vrot.slane %v693_v16, 1  ;;  %v714_v7 = vpack.c.bf16 %v701_v54, %v701_v54 }
 0x319   : > { %v705_v57 = vadd.f32 %v704_v52, %v703_v46 }
 0x31a   : > { %v880_v58 = vunpack.c.l.b16 %v711_v48  ;;  %v695_v56 = vadd.f32 %v694_v49, %v693_v16  ;;  %v883_v33 = vunpack.c.l.b16 %v714_v7  ;;  %1345 = vmatpush3.bf16.msra.mxu0 %v1407_v32 }
 0x31b   : > { %v706_v63 = vrot.slane %v705_v57, 1  ;;  %1346 = vmatprep.subr.bf16.mxu0 %v1487_v1  ;;  %v1235_v1 = vld [vmem:[%s1792_s7] ss:$0 sm:$0xff] }
 0x31c   : > { %v887_v61 = vsel %vm572_vm3, %v880_v58, %v886_v60  ;;  %v713_v62 = vpack.c.bf16 %v695_v56, %v695_v56 }
 0x31d   : > { %v707_v9 = vadd.f32 %v706_v63, %v705_v57  ;;  %v888_v10 = vsel %vm574_vm4, %v881_v0, %v887_v61 }
 0x31e   : > { %v882_v8 = vunpack.c.l.b16 %v713_v62  ;;  %1347 = vmatpush3.bf16.msra.mxu0 %v1408_v23 }
 0x31f   : > { %v715_v39 = vpack.c.bf16 %v707_v9, %v707_v9 }
 0x320   : > { %v889_v11 = vsel %vm576_vm5, %v882_v8, %v888_v10 }
 0x321   : > { %v884_v12 = vunpack.c.l.b16 %v715_v39  ;;  %v890_v15 = vsel %vm578_vm6, %v883_v33, %v889_v11 }
 0x323   : > { %v891_v18 = vsel %vm580_vm7, %v884_v12, %v890_v15 }
 0x324   : > { %v892_v19 = vpack.c.b16 %v891_v18, %v891_v18 }
 0x326   : > { %1329 = vmatmul.mubr.bf16.vlgmr.msra.gmra.mxu1 %v892_v19 }
 0x3e6   : > { %v976_v24 = vpop.f32.mrf.mxu1 }
 0x3e7   : > { %v977_v26 = vadd.f32 %v976_v24, %v1700_v20 }
 0x3e8   : > { %v1330_v27 = vpop.f32.mrf.mxu1 }
 0x3e9   : > { %v989_v28 = vadd.f32 %v1234_v25, %v977_v26 }
 0x3ea   : > { %v979_v29 = vpop.f32.mrf.mxu1 }
 0x3eb   : > { %1413 = vtanh.f32 %v989_v28 }
 0x3ec   : > { %v1331_v30 = vpop.f32.mrf.mxu1 }
 0x3f8   : > { %v1414_v31 = vpop.eup %1413 }
 0x3f9   : > { %v991_v34 = vpack.c.bf16 %v1414_v31, %v1414_v31 }
 0x3fb   : > { %1349 = vmatmul.mubr.bf16.vlgmr.msra.gmra.mxu0 %v991_v34 }
 0x4bb   : > { %v1097_v59 = vpop.f32.mrf.mxu0 }
 0x4bc   : > { %v1098_v35 = vadd.f32 %v1235_v1, %v1097_v59 }
 0x4bd   : > { %v1350_v20 = vpop.f32.mrf.mxu0 }
 0x4be   : > { %1104 = vst.msk [vmem:[%s369_s15] sm:$0xff] %vm1103_vm10, %v1098_v35 }
 0x4bf   : > { %v1100_v38 = vpop.f32.mrf.mxu0 }
 0x4c1   : > { %v1351_v36 = vpop.f32.mrf.mxu0 }
 0x4c2 PF: > { %s20_s27 = sadd.s32 1, %s1481_s27  }
 0x4c3   : > { %p17_p3 = scmp.ge.s32.totalorder %s20_s27, 6  }
 0x4c5   :  { %19 = sbr.rel (!%p17_p3) target bundleno = 2 (0x2), region = 97 }
 0x4ca   :  { %1124 = vsyncpa [#allocation3], 1 }
 0x4cb   :  { %1126 = vsyncpa [#allocation3 + $0x1], 1 }
 0x4cc   :  { %1127 = vsyncpa [#allocation5], 1 }

</bundles_post_ra>
